<compile_context>
chip_gen: v7x
topology: tpu7x:2x2x1
jax: 0.10.0
libtpu: 0.0.40
codegen_flags: <defaults>
</compile_context>

<pallas_src>
import functools

import numpy as np
import jax
import jax.numpy as jnp
from jax.experimental import pallas as pl
from jax.experimental.pallas import tpu as pltpu


_LANES = 128
_SUBLANES = 8
_NUM_CORES = 2                      # leading "parallel" grid axis (v7x dual TC)
_TARGET_BLOCK_BYTES = 2 << 20       # ~2 MiB of data per input block per step
_MAX_NATIVE_COLS = 32768            # guard against pathological trailing dims
_VMEM_LIMIT_BYTES = 32 * 1024 * 1024


def _round_up(x, m):
    return -(-int(x) // int(m)) * int(m)


def _pick_tile_rows(rows, cols, block_bytes):
    """Largest row tile (multiple of 8, or the full row extent) within budget."""
    cpad = _round_up(max(int(cols), 1), _LANES)
    cap = max(_SUBLANES, (int(block_bytes) // (cpad * 4)) // _SUBLANES * _SUBLANES)
    rows = int(rows)
    return rows if rows <= cap else cap


def _grid_and_row_map(rows, tile_r):
    """2-axis grid (core, tile) + clamped row-block index map."""
    n_blocks = -(-int(rows) // int(tile_r))
    tiles_per_core = -(-n_blocks // _NUM_CORES)
    grid = (_NUM_CORES, tiles_per_core)

    def row_block(c, i):
        # Fully out-of-range logical blocks are clamped onto the last real block
        # (in-bounds DMA); their contribution is zeroed by the in-kernel mask.
        return jnp.minimum(c * tiles_per_core + i, n_blocks - 1)

    return grid, tiles_per_core, row_block


def _as_2d_view(x):
    """Zero-copy 2-D view: lane-dense (rows,128) when possible, else natural."""
    total = int(x.size)
    if total % _LANES == 0:
        return x.reshape(total // _LANES, _LANES)          # free reshape
    lead = int(x.shape[0]) if x.ndim >= 2 else 1
    cols = total // lead
    if cols <= _MAX_NATIVE_COLS:
        return x.reshape(lead, cols)                       # free collapse
    # Pathological: huge, non-128-divisible trailing extent.  Pay one minimal
    # pad (single extra HBM pass) to recover a lane-dense layout.
    flat = x.reshape(-1)
    flat = jnp.pad(flat, (0, _round_up(total, _LANES) - total))
    return flat.reshape(-1, _LANES)


# ----------------------------------------------------------------------------
# Kernels: masked per-block contribution -> block-shaped VMEM accumulator ->
#          per-core scalar partial written once in the final pl.when.
# ----------------------------------------------------------------------------
def _elem_prod(a, b):
    return a * b


def _elem_sqdiff(a, b):
    d = a - b
    return d * d


def _elem_absdiff(a, b):
    return jnp.abs(a - b)


def _finalize(o_ref, acc_ref, scale):
    o_ref[...] = jnp.broadcast_to(jnp.sum(acc_ref[...]) * scale, o_ref.shape)


def _row_mask(shape, c, i, tiles_per_core, tile_r, rows_valid):
    base = (c * tiles_per_core + i) * tile_r
    row = jax.lax.broadcasted_iota(jnp.int32, shape, 0) + base
    return row < rows_valid


def _reduce2_kernel(a_ref, b_ref, o_ref, acc_ref, *, elem, scale, tile_r,
                    rows_valid, tiles_per_core):
    c, i = pl.program_id(0), pl.program_id(1)

    @pl.when(i == 0)
    def _():
        acc_ref[...] = jnp.zeros_like(acc_ref)

    a = a_ref[...].astype(jnp.float32)          # native-dtype DMA, cast in kernel
    b = b_ref[...].astype(jnp.float32)
    mask = _row_mask(a.shape, c, i, tiles_per_core, tile_r, rows_valid)
    acc_ref[...] += jnp.where(mask, elem(a, b), 0.0)        # pure-VPU accumulate

    @pl.when(i == pl.num_programs(1) - 1)
    def _():
        _finalize(o_ref, acc_ref, scale)


def _weighted_sq_kernel(p_ref, l_ref, w_ref, o_ref, acc_ref, *, scale, tile_r,
                        rows_valid, tiles_per_core):
    c, i = pl.program_id(0), pl.program_id(1)

    @pl.when(i == 0)
    def _():
        acc_ref[...] = jnp.zeros_like(acc_ref)

    d = p_ref[...].astype(jnp.float32) - l_ref[...].astype(jnp.float32)
    w = w_ref[...].astype(jnp.float32)          # (tile_r, 1) broadcast over lanes
    mask = _row_mask(d.shape, c, i, tiles_per_core, tile_r, rows_valid)
    acc_ref[...] += jnp.where(mask, w * (d * d), 0.0)       # mask after w-mul

    @pl.when(i == pl.num_programs(1) - 1)
    def _():
        _finalize(o_ref, acc_ref, scale)


def _pinball_kernel(p_ref, l_ref, q_ref, o_ref, acc_ref, *, scale, tile_r,
                    rows_valid, tiles_per_core):
    c, i = pl.program_id(0), pl.program_id(1)

    @pl.when(i == 0)
    def _():
        acc_ref[...] = jnp.zeros_like(acc_ref)

    diff = l_ref[...].astype(jnp.float32) - p_ref[...].astype(jnp.float32)
    q = q_ref[...].astype(jnp.float32)          # (1, T*Q) broadcast over rows
    # max-form pinball: q*d if d>=0 else (q-1)*d
    pin = jnp.maximum(q * diff, (q - 1.0) * diff)
    mask = _row_mask(diff.shape, c, i, tiles_per_core, tile_r, rows_valid)
    acc_ref[...] += jnp.where(mask, pin, 0.0)

    @pl.when(i == pl.num_programs(1) - 1)
    def _():
        _finalize(o_ref, acc_ref, scale)


# ----------------------------------------------------------------------------
# pallas_call wrapper: per-core partials, summed (tiny XLA add) in the wrapper
# ----------------------------------------------------------------------------
def _scalar_call(kernel, arrays, in_specs, grid, tile_r, ncols):
    out = pl.pallas_call(
        kernel,
        out_shape=jax.ShapeDtypeStruct((_NUM_CORES, _SUBLANES, _LANES), jnp.float32),
        grid=grid,
        in_specs=in_specs,
        out_specs=pl.BlockSpec((1, _SUBLANES, _LANES), lambda c, i: (c, 0, 0)),
        scratch_shapes=[pltpu.VMEM((tile_r, ncols), jnp.float32)],
        compiler_params=pltpu.CompilerParams(
            dimension_semantics=("parallel", "arbitrary"),
            vmem_limit_bytes=_VMEM_LIMIT_BYTES),
    )(*arrays)
    return jnp.sum(out[:, 0, 0])


def _flat_scalar_reduce(elem, scale, a, b, block_bytes=_TARGET_BLOCK_BYTES):
    a2 = _as_2d_view(a)
    b2 = b.reshape(a2.shape)                    # free (same element count)
    rows, cols = a2.shape
    tile_r = _pick_tile_rows(rows, cols, block_bytes)
    grid, tpc, row_block = _grid_and_row_map(rows, tile_r)
    data_spec = pl.BlockSpec((tile_r, cols), lambda c, i: (row_block(c, i), 0))
    kernel = functools.partial(_reduce2_kernel, elem=elem, scale=float(scale),
                               tile_r=tile_r, rows_valid=rows, tiles_per_core=tpc)
    return _scalar_call(kernel, [a2, b2], [data_spec, data_spec], grid, tile_r, cols)


def _weighted_sq_loss(p, l, w, block_bytes=_TARGET_BLOCK_BYTES):
    n = int(p.shape[0])
    p2 = p.reshape(n, -1)                       # natural layout, zero copies
    l2 = l.reshape(n, -1)
    cols = int(p2.shape[1])
    w2 = jnp.asarray(w).reshape(n, 1)           # per-row weight column
    tile_r = _pick_tile_rows(n, cols, block_bytes)
    grid, tpc, row_block = _grid_and_row_map(n, tile_r)
    data_spec = pl.BlockSpec((tile_r, cols), lambda c, i: (row_block(c, i), 0))
    w_spec = pl.BlockSpec((tile_r, 1), lambda c, i: (row_block(c, i), 0))
    kernel = functools.partial(_weighted_sq_kernel, scale=1.0, tile_r=tile_r,
                               rows_valid=n, tiles_per_core=tpc)
    return _scalar_call(kernel, [p2, l2, w2], [data_spec, data_spec, w_spec],
                        grid, tile_r, cols)


def _pinball_loss(p, l, quantiles, block_bytes=_TARGET_BLOCK_BYTES):
    n, t, q = (int(s) for s in p.shape)
    cols = t * q
    p2 = p.reshape(n, cols)                     # free collapse of trailing dims
    l2 = l.reshape(n, cols)
    # tiny periodic quantile row: column t*Q + qi carries quantiles[qi]
    qrow = jnp.tile(jnp.asarray(quantiles, jnp.float32).reshape(-1), t).reshape(1, cols)
    tile_r = _pick_tile_rows(n, cols, block_bytes)
    grid, tpc, row_block = _grid_and_row_map(n, tile_r)
    data_spec = pl.BlockSpec((tile_r, cols), lambda c, i: (row_block(c, i), 0))
    q_spec = pl.BlockSpec((1, cols), lambda c, i: (0, 0))   # resident constant
    kernel = functools.partial(_pinball_kernel, scale=1.0 / float(n * t),
                               tile_r=tile_r, rows_valid=n, tiles_per_core=tpc)
    return _scalar_call(kernel, [p2, l2, qrow], [data_spec, data_spec, q_spec],
                        grid, tile_r, cols)


# ----------------------------------------------------------------------------
# Loss (JAX / Pallas port of the torch module)
# ----------------------------------------------------------------------------
class Loss:
    def __init__(self, obj, params):
        self.obj = obj
        self.params = params
        self.block_bytes = int(params.get('_block_bytes', _TARGET_BLOCK_BYTES)) \
            if isinstance(params, dict) else _TARGET_BLOCK_BYTES

    def __call__(self, preds, labels):
        return self.forward(preds, labels)

    def forward(self, preds, labels):
        bb = self.block_bytes
        if self.obj == 'profit':
            # -sum(preds[1] * labels[0])  (negation folded into the kernel scale)
            return _flat_scalar_reduce(_elem_prod, -1.0, preds[1], labels[0], bb)
        elif self.obj == 'mse_sched':
            return _flat_scalar_reduce(_elem_sqdiff, 1.0, preds[1], labels[1], bb)
        elif self.obj == 'mse_sched_weighted':
            return _weighted_sq_loss(preds[1], labels[1], self.params['weights'], bb)
        elif self.obj == 'mse_price':
            return _flat_scalar_reduce(_elem_sqdiff, 1.0 / preds[0].size,
                                       preds[0], labels[0], bb)
        elif self.obj == 'mae_price':
            return _flat_scalar_reduce(_elem_absdiff, 1.0 / preds[0].size,
                                       preds[0], labels[0], bb)
        elif self.obj == 'pinball':
            return _pinball_loss(preds[0], labels[0],
                                 self.params['quantile_tensor'], bb)
        else:
            raise ValueError(f'{self.obj} unsupported loss function')


# ----------------------------------------------------------------------------
# self-test (numpy float64 references mirror the torch code)
# ----------------------------------------------------------------------------
def _check(name, value, ref, rtol=2e-3, atol=1e-5):
    value = jax.block_until_ready(value)
    np.testing.assert_allclose(np.asarray(value, np.float64), ref,
                               rtol=rtol, atol=atol, err_msg=name)


if __name__ == "__main__":
    key = jax.random.PRNGKey(0)
    k = jax.random.split(key, 12)

    # --- small shapes, default tiling (single block, natural layouts) ---------
    N, L, T, Q = 4, 8, 8, 3
    p_price = jax.random.normal(k[0], (N, L), jnp.float32)
    p_sched = jax.random.normal(k[1], (N, L), jnp.float32)
    l_price = jax.random.normal(k[2], (N, L), jnp.float32)
    l_sched = jax.random.normal(k[3], (N, L), jnp.float32)
    w = jax.random.uniform(k[4], (N,), jnp.float32)
    p_q = jax.random.normal(k[5], (N, T, Q), jnp.float32)
    l_q = jax.random.normal(k[6], (N, T, Q), jnp.float32)
    quantiles = jnp.array([0.1, 0.5, 0.9], jnp.float32)

    preds2, labels2 = [p_price, p_sched], [l_price, l_sched]
    preds3, labels3 = [p_q], [l_q]

    pp, ps = np.asarray(p_price, np.float64), np.asarray(p_sched, np.float64)
    lp, ls = np.asarray(l_price, np.float64), np.asarray(l_sched, np.float64)
    wn = np.asarray(w, np.float64)
    pq, lq = np.asarray(p_q, np.float64), np.asarray(l_q, np.float64)
    qn = np.asarray(quantiles, np.float64)

    _check('profit', Loss('profit', {})(preds2, labels2), -np.sum(ps * lp))
    _check('mse_sched', Loss('mse_sched', {})(preds2, labels2),
           np.sum(np.square(ps - ls)))
    _check('mse_sched_weighted',
           Loss('mse_sched_weighted', {'weights': w})(preds2, labels2),
           np.sum(np.sum(np.square(ps - ls), axis=1) * wn))
    _check('mse_price', Loss('mse_price', {})(preds2, labels2),
           np.mean(np.square(pp - lp)))
    _check('mae_price', Loss('mae_price', {})(preds2, labels2),
           np.mean(np.abs(pp - lp)))
    diff = lq - pq
    pin_ref = np.mean(np.sum(np.where(diff >= 0, diff, 0.0) * qn
                             - np.where(diff >= 0, 0.0, diff) * (1.0 - qn), axis=2))
    _check('pinball',
           Loss('pinball', {'quantile_tensor': quantiles})(preds3, labels3), pin_ref)

    # --- larger shapes + tiny block budget: exercises the multi-block grid, ---
    # --- the dual-core split, the clamped index map and the partial-row mask --
    tiny = {'_block_bytes': 4096}

    a = jax.random.normal(k[7], (64, 64), jnp.float32)      # lane-dense path
    b = jax.random.normal(k[8], (64, 64), jnp.float32)
    _check('profit_multiblock', Loss('profit', tiny)([a, a], [b, b]),
           -np.sum(np.asarray(a, np.float64) * np.asarray(b, np.float64)))

    a2 = jax.random.normal(k[9], (100, 37), jnp.float32)    # natural 2-D path
    b2 = jax.random.normal(k[10], (100, 37), jnp.float32)
    _check('mse_price_ragged', Loss('mse_price', tiny)([a2, a2], [b2, b2]),
           np.mean(np.square(np.asarray(a2, np.float64) - np.asarray(b2, np.float64))))

    w2 = jax.random.uniform(k[11], (100,), jnp.float32)
    tiny_w = dict(tiny, weights=w2)
    _check('mse_sched_weighted_ragged',
           Loss('mse_sched_weighted', tiny_w)([a2, a2], [b2, b2]),
           np.sum(np.sum(np.square(np.asarray(a2, np.float64)
                                   - np.asarray(b2, np.float64)), axis=1)
                  * np.asarray(w2, np.float64)))

    print("KERNEL_OK")
</pallas_src>

<mosaic_0001>
module attributes {stable_mosaic.version = 11 : i64} {
  func.func @_reduce2_kernel(%arg0: i32, %arg1: i32, %arg2: memref<4x8xf32, #tpu.memory_space<vmem>>, %arg3: memref<4x8xf32, #tpu.memory_space<vmem>>, %arg4: memref<1x8x128xf32, #tpu.memory_space<vmem>>, %arg5: memref<4x8xf32, #tpu.memory_space<vmem>>) attributes {dimension_semantics = [#tpu.dimension_semantics<parallel>, #tpu.dimension_semantics<arbitrary>], iteration_bounds = array<i64: 2, 1>, scalar_prefetch = 0 : i64, scratch_operands = 1 : i64, tpu.core_type = #tpu.core_type<tc>, window_params = [{transform_indices = @transform_0, window_bounds = array<i64: 4, 8>}, {transform_indices = @transform_1, window_bounds = array<i64: 4, 8>}, {transform_indices = @transform_2, window_bounds = array<i64: 1, 8, 128>}]} {
    %c0_i32 = arith.constant 0 : i32
    %0 = arith.cmpi eq, %arg1, %c0_i32 : i32
    %1 = arith.extui %0 : i1 to i32
    %c0_i32_0 = arith.constant 0 : i32
    %2 = arith.cmpi ne, %1, %c0_i32_0 : i32
    scf.if %2 {
      %cst_11 = arith.constant 0.000000e+00 : f32
      %22 = vector.broadcast %cst_11 : f32 to vector<4x8xf32>
      %c0_12 = arith.constant 0 : index
      %c0_13 = arith.constant 0 : index
      %23 = vector.load %arg5[%c0_12, %c0_13] : memref<4x8xf32, #tpu.memory_space<vmem>>, vector<4x8xf32>
      tpu.vector_store %arg5[%c0_12, %c0_13], %22 {strides = array<i32>} : memref<4x8xf32, #tpu.memory_space<vmem>>, vector<4x8xf32>,
    } else {
    }
    %c0 = arith.constant 0 : index
    %c0_1 = arith.constant 0 : index
    %3 = vector.load %arg2[%c0, %c0_1] : memref<4x8xf32, #tpu.memory_space<vmem>>, vector<4x8xf32>
    %c0_2 = arith.constant 0 : index
    %c0_3 = arith.constant 0 : index
    %4 = vector.load %arg3[%c0_2, %c0_3] : memref<4x8xf32, #tpu.memory_space<vmem>>, vector<4x8xf32>
    %c1_i32 = arith.constant 1 : i32
    %5 = arith.muli %arg0, %c1_i32 : i32
    %6 = arith.addi %5, %arg1 : i32
    %c4_i32 = arith.constant 4 : i32
    %7 = arith.muli %6, %c4_i32 : i32
    %8 = tpu.iota {dimensions = array<i32: 0>} : vector<4x8xi32>
    %9 = vector.broadcast %7 : i32 to vector<4x8xi32>
    %10 = arith.addi %8, %9 : vector<4x8xi32>
    %c4_i32_4 = arith.constant 4 : i32
    %11 = vector.broadcast %c4_i32_4 : i32 to vector<4x8xi32>
    %12 = arith.cmpi slt, %10, %11 : vector<4x8xi32>
    %c0_5 = arith.constant 0 : index
    %c0_6 = arith.constant 0 : index
    %13 = vector.load %arg5[%c0_5, %c0_6] : memref<4x8xf32, #tpu.memory_space<vmem>>, vector<4x8xf32>
    %14 = arith.mulf %3, %4 : vector<4x8xf32>
    %cst = arith.constant 0.000000e+00 : f32
    %15 = vector.broadcast %cst : f32 to vector<4x8xf32>
    %16 = arith.select %12, %14, %15 : vector<4x8xi1>, vector<4x8xf32>
    %17 = arith.addf %13, %16 : vector<4x8xf32>
    %c0_7 = arith.constant 0 : index
    %c0_8 = arith.constant 0 : index
    %18 = vector.load %arg5[%c0_7, %c0_8] : memref<4x8xf32, #tpu.memory_space<vmem>>, vector<4x8xf32>
    tpu.vector_store %arg5[%c0_7, %c0_8], %17 {strides = array<i32>} : memref<4x8xf32, #tpu.memory_space<vmem>>, vector<4x8xf32>,
    %c0_i32_9 = arith.constant 0 : i32
    %19 = arith.cmpi eq, %arg1, %c0_i32_9 : i32
    %20 = arith.extui %19 : i1 to i32
    %c0_i32_10 = arith.constant 0 : i32
    %21 = arith.cmpi ne, %20, %c0_i32_10 : i32
    scf.if %21 {
      %c0_11 = arith.constant 0 : index
      %c0_12 = arith.constant 0 : index
      %22 = vector.load %arg5[%c0_11, %c0_12] : memref<4x8xf32, #tpu.memory_space<vmem>>, vector<4x8xf32>
      %23 = vector.shape_cast %22 : vector<4x8xf32> to vector<1x4x8xf32>
      %cst_13 = arith.constant dense<0.000000e+00> : vector<1xf32>
      %24 = vector.multi_reduction <add>, %23, %cst_13 [1, 2] : vector<1x4x8xf32> to vector<1xf32>
      %25 = vector.shape_cast %24 : vector<1xf32> to vector<1x1x1xf32>
      %26 = vector.extract %25[0, 0, 0] : f32 from vector<1x1x1xf32>
      %cst_14 = arith.constant -1.000000e+00 : f32
      %27 = arith.mulf %26, %cst_14 : f32
      %28 = vector.broadcast %27 : f32 to vector<1x8x128xf32>
      %c0_15 = arith.constant 0 : index
      %c0_16 = arith.constant 0 : index
      %c0_17 = arith.constant 0 : index
      %29 = vector.load %arg4[%c0_15, %c0_16, %c0_17] : memref<1x8x128xf32, #tpu.memory_space<vmem>>, vector<1x8x128xf32>
      tpu.vector_store %arg4[%c0_15, %c0_16, %c0_17], %28 {strides = array<i32>} : memref<1x8x128xf32, #tpu.memory_space<vmem>>, vector<1x8x128xf32>,
    } else {
    }
    return
  }
  func.func @transform_0(%arg0: i32, %arg1: i32) -> (i32, i32) {
    %c1_i32 = arith.constant 1 : i32
    %0 = arith.muli %arg0, %c1_i32 : i32
    %1 = arith.addi %0, %arg1 : i32
    %c0_i32 = arith.constant 0 : i32
    %2 = arith.minsi %1, %c0_i32 : i32
    %c0_i32_0 = arith.constant 0 : i32
    %c0_i32_1 = arith.constant 0 : i32
    return %2, %c0_i32_0 : i32, i32
  }
  func.func @transform_1(%arg0: i32, %arg1: i32) -> (i32, i32) {
    %c1_i32 = arith.constant 1 : i32
    %0 = arith.muli %arg0, %c1_i32 : i32
    %1 = arith.addi %0, %arg1 : i32
    %c0_i32 = arith.constant 0 : i32
    %2 = arith.minsi %1, %c0_i32 : i32
    %c0_i32_0 = arith.constant 0 : i32
    %c0_i32_1 = arith.constant 0 : i32
    return %2, %c0_i32_0 : i32, i32
  }
  func.func @transform_2(%arg0: i32, %arg1: i32) -> (i32, i32, i32) {
    %c0_i32 = arith.constant 0 : i32
    %c0_i32_0 = arith.constant 0 : i32
    %c0_i32_1 = arith.constant 0 : i32
    return %arg0, %c0_i32, %c0_i32_0 : i32, i32, i32
  }
}

</mosaic_0001>

<bundles_post_ra>
// kernel: tpu_custom_call.1
= control target key start
LH: loop header
LB: loop body
LE: loop exit
PB: predicated region body
PF: predicated region fallthrough
CT: control target
= control target key end

     0   :  { %7 = vsyncpa [#allocation4], 0  ;;  %s889_s0 = inlined_call_operand.hbm [shape: f32[4,8], index: 0, kind: input, shape index: {}]   ;;  %s890_s1 = inlined_call_operand.hbm [shape: f32[4,8], index: 1, kind: input, shape index: {}]   ;;  %s891_s2 = inlined_call_operand.hbm [shape: f32[2,8,128], index: 2, kind: output, shape index: {}]  }
   0x1   :  { %9 = vsyncpa [#allocation4 + $0x1], 0 }
   0x2   :  { %10 = vsyncpa [#allocation7], 0 }
   0x3   :  { %12 = vsyncpa [#allocation7 + $0x1], 0 }
   0x4   :  { %13 = vsyncpa [#allocation5], 0 }
   0x5   :  { %15 = vsyncpa [#allocation5 + $0x1], 0  ;;  %s684_s9 = smov 0   ;;  %s686_s10 = smov 0  }
   0x6   :  { %s688_s11 = smov 0   ;;  %s690_s12 = smov 0  }
   0x7   :  { %s692_s13 = smov 0   ;;  %s694_s14 = smov 0  }
   0x8   :  { %s696_s15 = smov 0   ;;  %s698_s16 = smov 0  }
   0x9 LB: > { %s385_s17 = sadd.s32 4294967295, %s663_s16   ;;  %s386_s18 = sadd.s32 4294967294, %s663_s16   ;;  %s663_s16 = sphi %s698_s16, %s21_s16   ;;  %s659_s15 = sphi %s696_s15, %s912_s15   ;;  %s655_s14 = sphi %s694_s14, %s911_s14   ;;  %s651_s13 = sphi %s692_s13, %s879_s13   ;;  %s647_s12 = sphi %s690_s12, %s910_s12   ;;  %s643_s11 = sphi %s688_s11, %s909_s11   ;;  %s639_s10 = sphi %s686_s10, %s908_s10   ;;  %s635_s9 = sphi %s684_s9, %s907_s9  }
   0xa   : > { %s33_s19 = sadd.s32 1, %s659_s15  ;;  %p632_p1 = scmp.ne.s32.totalorder %s651_s13, 0 }
   0xb   : > { %p35_p0 = scmp.ge.s32.totalorder %s33_s19, 2  ;;  %p54_p2 = scmp.eq.s32.totalorder %s663_s16, 0 }
   0xc   : > { %p59_p3 = scmp.ne.s32.totalorder %s651_s13, %s647_s12  ;;  %p60_p5 = scmp.eq.s32.totalorder %s385_s17, 0 }
   0xd   : > { %s914_s19 = smov (%p35_p0, %s33_s19), 0  ;;  %p730_p4 = por %p632_p1, %p54_p2 }
   0xe   : > { %p734_p6 = por %p60_p5, %p59_p3  ;;  %s101_s22 = ssub.s32 %s659_s15, %s914_s19 }
   0xf   : > { %p102_p7 = scmp.eq.s32.totalorder %s101_s22, 0  ;;  %s104_s23 = sadd.s32 1, %s643_s11 }
  0x10   : > { %s895_s21 = scalar_select %p734_p6, 1, 0 }
  0x11   : > { %s742_s24 = scalar_select %p102_p7, %s643_s11, %s104_s23  }
  0x12   : > { %p114_p8 = scmp.ne.s32.totalorder %s643_s11, %s639_s10  ;;  %p115_p9 = scmp.eq.s32.totalorder %s385_s17, 1 }
  0x13   : > { %p120_p10 = scmp.ne.s32.totalorder %s639_s10, %s635_s9  ;;  %p121_p11 = scmp.eq.s32.totalorder %s386_s18, 1 }
  0x14   : > { %p748_p12 = por %p115_p9, %p114_p8  ;;  %p421_p1 = scmp.lt.s32.totalorder %s663_s16, 2 }
  0x15   : > { %p753_p0 = por %p121_p11, %p120_p10  ;;  %s665_s27 = smov [#allocation3]  }
  0x16   : > { %s896_s25 = scalar_select %p748_p12, 1, 0 }
  0x17   : > { %s897_s26 = scalar_select %p753_p0, 1, 0 }
  0x18   : > { %s155_s28 = sshll.u32 %s665_s27, 4  ;;  %p760_p2 = pnand %p421_p1, %p730_p4  ;;  %s156_s28 = int_to_ptr.vmem [resolvable:$true] %s155_s28 }
  0x19   : > { %s496_s4 = scalar_lea.hbm %s889_s0, 64 }
  0x1a   : > { %p497_p7 = scmp.ne.s32.totalorder %s889_s0, %s496_s4  ;;  %p498_p8 = pneg %p760_p2 }
  0x1b   : > { %p503_p10 = scmp.lt.u32.totalorder %s496_s4, %s496_s4  ;;  %p505_p11 = scmp.lt.u32.totalorder %s496_s4, %s889_s0 }
  0x1c   : > { %p499_p4 = pnand %p498_p8, %p497_p7 }
  0x1d   : > { %p506_p1 = por %p505_p11, %p503_p10 }
  0x1e   : > { %p500_p9 = pneg %p499_p4 }
  0x20   : > { %p507_p13 = pnand %p506_p1, %p500_p9 }
  0x22   : > { %510 = shalt.err (!%p507_p13)
}
  0x23   : > { %s511_s12 = scalar_lea.vmem %s156_s28, 64  ;;  %s518_s17 = scalar_lea.vmem %s156_s28, 128 }
  0x24   : > { %p512_p3 = scmp.ne.s32.totalorder %s156_s28, %s511_s12  ;;  %p519_p12 = scmp.lt.s32.totalorder %s156_s28, %s156_s28 }
  0x25   : > { %p520_p6 = scmp.lt.s32.totalorder %s518_s17, %s511_s12 }
  0x26   : > { %p514_p5 = pnand %p512_p3, %p498_p8 }
  0x27   : > { %p521_p7 = por %p520_p6, %p519_p12 }
  0x28   : > { %p515_p0 = pneg %p514_p5 }
  0x2a   : > { %p522_p4 = pnand %p521_p7, %p515_p0 }
  0x2c   : > { %525 = shalt.err (!%p522_p4)
}
  0x2d   : > { %413 = dma.hbm_to_vmem [thread:$0]  (!%p760_p2), %s889_s0, 64, %s156_s28, [#allocation4]  }
  0x2e   : > { %p899_p13 = scmp.lt.s32.totalorder %s663_s16, 3  ;;  %p900_p9 = scmp.ge.s32.totalorder %s663_s16, 1 }
  0x2f   : > { %s666_s23 = smov [#allocation6]   ;;  %s526_s4 = scalar_lea.hbm %s890_s1, 64 }
  0x30   : > { %p792_p10 = pnand %p900_p9, %p899_p13  ;;  %s176_s27 = sshll.u32 %s666_s23, 4  ;;  %s177_s27 = int_to_ptr.vmem [resolvable:$true] %s176_s27 }
  0x31   : > { %p527_p6 = scmp.ne.s32.totalorder %s890_s1, %s526_s4  ;;  %p533_p3 = scmp.lt.u32.totalorder %s526_s4, %s526_s4 }
  0x32   : > { %s901_s22 = scalar_select %p792_p10, 1, 0 }
  0x33   : > { %p529_p12 = pnand %p527_p6, %p498_p8  ;;  %p535_p5 = scmp.lt.u32.totalorder %s526_s4, %s890_s1 }
  0x35   : > { %p530_p0 = pneg %p529_p12  ;;  %p536_p11 = por %p535_p5, %p533_p3 }
  0x37   : > { %p537_p1 = pnand %p536_p11, %p530_p0 }
  0x39   : > { %540 = shalt.err (!%p537_p1)
}
  0x3a   : > { %s541_s8 = scalar_lea.vmem %s177_s27, 64  ;;  %s548_s12 = scalar_lea.vmem %s177_s27, 128 }
  0x3b   : > { %p542_p7 = scmp.ne.s32.totalorder %s177_s27, %s541_s8  ;;  %p549_p9 = scmp.lt.s32.totalorder %s177_s27, %s177_s27 }
  0x3c   : > { %p550_p10 = scmp.lt.s32.totalorder %s548_s12, %s541_s8 }
  0x3d   : > { %p544_p4 = pnand %p542_p7, %p498_p8 }
  0x3e   : > { %p551_p6 = por %p550_p10, %p549_p9 }
  0x3f   : > { %p545_p13 = pneg %p544_p4 }
  0x41   : > { %p552_p12 = pnand %p551_p6, %p545_p13 }
  0x43   : > { %555 = shalt.err (!%p552_p12)
}
  0x44   : > { %416 = dma.hbm_to_vmem [thread:$0]  (!%p760_p2), %s890_s1, 64, %s177_s27, [#allocation7]  }
  0x45   : > { %p902_p0 = scmp.ne.s32.totalorder %s901_s22, 0 }
  0x46   : > { %s187_s20 = sand.u32 (!%p902_p0), 1, %s651_s13   ;;  %p903_p8 = scmp.ne.s32.totalorder (!%p902_p0), %s895_s21, 0 }
  0x47   : > { %185 = sbr.rel (%p902_p0) target bundleno = 322 (0x142), region = 28  ;;  %s394_s23 = sshll.u32 (!%p902_p0), %s187_s20, 2 }
  0x48   : > { %s188_s30 = scalar_lea.sflag (!%p902_p0), [#allocation4], %s187_s20  ;;  %s191_s3 = scalar_lea.vmem (!%p902_p0), [#allocation3], %s394_s23 }
  0x4e   : > { %621 = dma.done.wait (%p903_p8), %s188_s30, 64  }
  0x4f   : > { %623 = vsyncadd (%p903_p8), %s188_s30, 4294967232  ;;  %s197_s29 = scalar_lea.sflag [#allocation7], %s187_s20  ;;  %s200_s4 = scalar_lea.vmem [#allocation6], %s394_s23 }
  0x50   : > { %625 = dma.done.wait (%p903_p8), %s197_s29, 64  }
  0x51   : > { %627 = vsyncadd (%p903_p8), %s197_s29, 4294967232  ;;  %vm236_vm0 = vcmask 60416   ;;  %s397_s22 = sshll.u32 %s655_s14, 2  ;;  %v242_v0 = vlaneseq  ;;  %v667_v1 = vmov 0.0   ;;  %v238_v5 = vld [vmem:[%s191_s3] sm:$0xf] }
  0x52   : > { %237 = vst.msk [vmem:[#allocation2] sm:$0xf] %vm236_vm0, %v667_v1  ;;  %v244_v2 = vstv %s397_s22  ;;  %v239_v6 = vld [vmem:[%s200_s4] sm:$0xf]  ;;  %s223_s21 = sand.u32 1, %s639_s10   ;;  %s399_s28 = sshll.u32 %s655_s14, 7 }
  0x53   : > { %v243_v3 = vshrl.u32 %v242_v0, 7  ;;  %v248_v8 = vmul.f32 %v239_v6, %v238_v5  ;;  %s396_s27 = sshll.u32 %s223_s21, 3  ;;  %s836_s18 = scalar_lea.hbm %s891_s2, %s399_s28 }
  0x54   : > { %s225_s5 = scalar_lea.vmem [#allocation8], %s396_s27  ;;  %s271_s20 = scalar_lea.sflag [#allocation5], %s223_s21 }
  0x55   : > { %v245_v4 = vadd.s32 %v244_v2, %v243_v3  ;;  %s284_s6 = sshll.u32 %s225_s5, 4  ;;  %p904_p10 = scmp.ne.s32.totalorder %s896_s25, 0  ;;  %s838_s6 = int_to_ptr.vmem [resolvable:$true] %s284_s6 }
  0x56   : > { %s556_s23 = scalar_lea.vmem %s838_s6, 128  ;;  %s668_s14 = smov [#allocation8]  }
  0x57   : > { %vm246_vm1 = vcmp.lt.s32.totalorder %v245_v4, 4  ;;  %p557_p2 = scmp.ne.s32.totalorder %s838_s6, %s556_s23  ;;  %s560_s30 = sshll.u32 %s668_s14, 4  ;;  %s561_s30 = int_to_ptr.vmem [resolvable:$false] %s560_s30 }
  0x58   : > { %v249_v9 = vsel %vm246_vm1, %v248_v8, 0.0  ;;  %s562_s3 = scalar_lea.vmem %s561_s30, 256  ;;  %p563_p11 = scmp.lt.s32.totalorder %s838_s6, %s561_s30 }
  0x59   : > { %v247_v7 = vld [vmem:[#allocation2] sm:$0xf]  ;;  %p558_p3 = pnand %p557_p2, %p904_p10  ;;  %p564_p1 = scmp.lt.s32.totalorder %s562_s3, %s556_s23 }
  0x5a   : > { %v250_v10 = vadd.f32 %v249_v9, %v247_v7 }
  0x5b   : > { %p559_p5 = pneg %p558_p3  ;;  %p565_p7 = por %p564_p1, %p563_p11 }
  0x5c   : > { %252 = vst.msk [vmem:[#allocation2] sm:$0xf] %vm236_vm0, %v250_v10 }
  0x5d   : > { %p566_p4 = pnand %p565_p7, %p559_p5 }
  0x63   : > { %v256_v11 = vld [vmem:[#allocation2] sm:$0xf] }
  0x64   : > { %v257_v12 = vsel %vm236_vm0, %v256_v11, 0.0 }
  0x65   : > { %258 = vadd.xlane.f32.xlu0 %v257_v12 }
  0xf2   : > { %v259_v13 = vpop.xlane.xlu0 %258 }
  0xf3   : > { %v260_v14 = vrot.slane %v259_v13, 4 }
  0xf5   : > { %v261_v15 = vadd.f32 %v260_v14, %v259_v13 }
  0xf7   : > { %v262_v16 = vrot.slane %v261_v15, 2 }
  0xf9   : > { %v263_v17 = vadd.f32 %v262_v16, %v261_v15 }
  0xfb   : > { %v264_v18 = vrot.slane %v263_v17, 1 }
  0xfd   : > { %v265_v19 = vadd.f32 %v264_v18, %v263_v17 }
  0xff   : > { %402 = vpush %v265_v19 }
 0x130   : > { %s403_s7 = spop %402 }
 0x131   : > { %s267_s8 = smul.f32 -1.0, %s403_s7 }
 0x133   : > { %v268_v20 = vstv %s267_s8 }
 0x134   : > { %269 = vst [vmem:[%s225_s5] sm:$0xff] %v268_v20 }
 0x135   : > { %569 = shalt.err (!%p566_p4)
}
 0x136   : > { %s570_s29 = scalar_lea.hbm %s836_s18, 128  ;;  %s574_s21 = scalar_lea.hbm %s891_s2, 256 }
 0x137   : > { %p571_p13 = scmp.ne.s32.totalorder %s836_s18, %s570_s29  ;;  %p575_p12 = scmp.lt.u32.totalorder %s836_s18, %s891_s2 }
 0x138   : > { %p576_p0 = scmp.lt.u32.totalorder %s574_s21, %s570_s29  ;;  %p578_p2 = scmp.lt.u32.totalorder %s570_s29, %s836_s18 }
 0x139   : > { %p572_p9 = pnand %p571_p13, %p904_p10 }
 0x13a   : > { %p577_p8 = por %p576_p0, %p575_p12 }
 0x13b   : > { %p573_p6 = pneg %p572_p9 }
 0x13c   : > { %p579_p3 = por %p578_p2, %p577_p8 }
 0x13e   : > { %p580_p5 = pnand %p579_p3, %p573_p6 }
 0x140   : > { %583 = shalt.err (!%p580_p5)
}
 0x141   : > { %408 = dma.vmem_to_hbm [thread:$0]  (%p904_p10), %s838_s6, 128, %s836_s18, %s271_s20  }
 0x142 PF: > { %s296_s28 = sand.u32 1, %s635_s9   ;;  %p905_p11 = scmp.ne.s32.totalorder %s897_s26, 0 }
 0x143   : > { %p906_p1 = scmp.ge.s32.totalorder %s663_s16, 2  ;;  %s297_s7 = scalar_lea.sflag [#allocation5], %s296_s28 }
 0x145   : > { %p418_p7 = pnand %p906_p1, %p905_p11 }
 0x147   : > { %629 = dma.done.wait (!%p418_p7), %s297_s7, 128  }
 0x148   : > { %631 = vsyncadd (!%p418_p7), %s297_s7, 4294967168  ;;  %s21_s16 = sadd.s32 1, %s663_s16   ;;  %s907_s9 = smov %s639_s10 }
 0x149   : > { %p18_p4 = scmp.ge.s32.totalorder %s21_s16, 4   ;;  %s908_s10 = smov %s643_s11 }
 0x14a   : > { %s909_s11 = smov %s742_s24  ;;  %s910_s12 = smov %s651_s13 }
 0x14b   : > { %s879_s13 = smov 0   ;;  %s911_s14 = smov %s659_s15 }
 0x14c   : > { %s912_s15 = smov %s914_s19  ;;  %20 = sbr.rel (!%p18_p4) target bundleno = 9 (0x9), region = 94 }
 0x153   :  { %302 = vsyncpa [#allocation4], 1 }
 0x154   :  { %304 = vsyncpa [#allocation4 + $0x1], 1 }
 0x155   :  { %305 = vsyncpa [#allocation7], 1 }
 0x156   :  { %307 = vsyncpa [#allocation7 + $0x1], 1 }
 0x157   :  { %308 = vsyncpa [#allocation5], 1 }
 0x158   :  { %310 = vsyncpa [#allocation5 + $0x1], 1 }

</bundles_post_ra>
